<compile_context>
chip_gen: v7x
topology: tpu7x:2x2x1
jax: 0.10.0
libtpu: 0.0.40
codegen_flags: <defaults>
</compile_context>

<pallas_src>
import functools
import math

import jax
import jax.numpy as jnp
from jax.experimental import pallas as pl
from jax.experimental.pallas import tpu as pltpu


# --------------------------------------------------------------------------
# Kernels
# --------------------------------------------------------------------------
def _gin_conv_kernel(a_ref, x_ref, w1_ref, b1_ref, w2_ref, b2_ref, out_ref,
                     *, apply_relu: bool):
    """One GINConv layer for a row tile of nodes: out = nn( (A+I)_tile @ x )."""
    f32 = jnp.float32
    # int8 -> bf16 upcast of the streamed adjacency tile, then MXU dot (f32 acc).
    a_bf = a_ref[...].astype(jnp.bfloat16)                              # [TM, N_pad]
    h = jnp.dot(a_bf, x_ref[...], preferred_element_type=f32)           # [TM, D]
    h = jnp.maximum(
        jnp.dot(h, w1_ref[...], preferred_element_type=f32) + b1_ref[...], 0.0)
    h = jnp.dot(h, w2_ref[...], preferred_element_type=f32) + b2_ref[...]
    if apply_relu:                                                      # the ('relu',) MLP layer
        h = jnp.maximum(h, 0.0)
    out_ref[...] = h.astype(out_ref.dtype)


def _pool_fc_kernel(h_ref, m_ref, fw1_ref, fb1_ref, fw2_ref, fb2_ref,
                    out_ref, pool_ref, *, num_graphs_padded: int, num_classes: int):
    """Masked global max-pool accumulation per row tile + fc + log_softmax."""
    i = pl.program_id(0)

    @pl.when(i == 0)
    def _init():
        pool_ref[...] = jnp.full(pool_ref.shape, -jnp.inf, dtype=pool_ref.dtype)

    h = h_ref[...]                                                      # [TM, D]
    m = m_ref[...]                                                      # [TM, G_pad]
    # Small unrolled loop over graphs: each step is a [TM, D] where + sublane max.
    for g in range(num_graphs_padded):
        masked = jnp.where(m[:, g:g + 1] > 0.5, h, -jnp.inf)            # [TM, D]
        row = jnp.max(masked, axis=0, keepdims=True)                    # [1, D]
        pool_ref[g:g + 1, :] = jnp.maximum(pool_ref[g:g + 1, :], row)

    # ---- final step: fc head + masked log_softmax (classes padded to 128 lanes) ----
    @pl.when(i == pl.num_programs(0) - 1)
    def _finalize():
        pooled = pool_ref[...]                                          # [G_pad, D]
        z = jnp.maximum(
            jnp.dot(pooled, fw1_ref[...], preferred_element_type=jnp.float32)
            + fb1_ref[...], 0.0)
        z = jnp.dot(z, fw2_ref[...], preferred_element_type=jnp.float32) + fb2_ref[...]
        cmask = jax.lax.broadcasted_iota(jnp.int32, z.shape, 1) < num_classes
        zm = jnp.where(cmask, z, -jnp.inf)
        zmax = jnp.max(zm, axis=1, keepdims=True)
        denom = jnp.sum(jnp.exp(zm - zmax), axis=1, keepdims=True)
        out_ref[...] = z - zmax - jnp.log(denom)


# --------------------------------------------------------------------------
# Wrapper
# --------------------------------------------------------------------------
def _round_up(v: int, m: int) -> int:
    return ((v + m - 1) // m) * m


def _pad2(a, rows: int, cols: int):
    r, c = a.shape
    return jnp.pad(a, ((0, rows - r), (0, cols - c)))


def _vmem_limit(nbytes: int) -> int:
    return int(min(max(int(nbytes * 1.5) + (2 << 20), 16 << 20), 128 << 20))


def ginnet_forward(x, adj, pool_mask, params, *, tile_m: int = 256):
    """x: [N, F] f32, adj: [N, N] f32 symmetric 0/1, pool_mask: [G, N] f32 one-hot batch."""
    N, F = x.shape
    G = pool_mask.shape[0]
    C = params["fc2_w"].shape[1]

    # Lane-dense padded width for every feature / hidden / class dimension (keep = 128).
    dims = (F, params["g1_w1"].shape[1], params["g1_w2"].shape[1],
            params["g2_w1"].shape[1], params["g2_w2"].shape[1],
            params["fc1_w"].shape[1], C)
    D = _round_up(max(dims), 128)

    # Node-row tiling: tm multiple of 32 (int8/bf16 packing), streamed K axis = 128-mult.
    tm = max(32, min(tile_m, _round_up(N, 32)))
    tm = _round_up(tm, 32)
    n_pad = _round_up(N, math.lcm(tm, 128))
    g_pad = _round_up(G, 8)
    grid = (n_pad // tm,)

    f32 = jnp.float32
    bf16 = jnp.bfloat16

    # (A + I): GIN eps=0 self-term folded into the adjacency; stored as int8.
    a_full = adj.astype(f32) + jnp.eye(N, dtype=f32)
    a_i8 = _pad2(a_full, n_pad, n_pad).astype(jnp.int8)                 # [N_pad, N_pad]

    x_bf = _pad2(x.astype(f32), n_pad, D).astype(bf16)                  # [N_pad, D] bf16
    mask_t = _pad2(pool_mask.astype(f32).T, n_pad, g_pad)               # [N_pad, G_pad]

    wpad = lambda k: _pad2(params[k].astype(f32), D, D)
    bpad = lambda k: _pad2(params[k].astype(f32), 1, D)

    a_spec = pl.BlockSpec((tm, n_pad), lambda i: (i, 0))
    full_spec = pl.BlockSpec((n_pad, D), lambda i: (0, 0))
    w_spec = pl.BlockSpec((D, D), lambda i: (0, 0))
    b_spec = pl.BlockSpec((1, D), lambda i: (0, 0))
    row_spec = pl.BlockSpec((tm, D), lambda i: (i, 0))
    mask_spec = pl.BlockSpec((tm, g_pad), lambda i: (i, 0))

    # Explicit VMEM plan: 2x A tile (int8) + resident bf16 x/h + 2x out tile + weights.
    conv_bytes = (2 * tm * n_pad * 1 + 2 * n_pad * D * 2 + 2 * tm * D * 4
                  + 2 * 4 * (D * D * 4 + D * 4))
    conv_params = pltpu.CompilerParams(dimension_semantics=("parallel",),
                                       vmem_limit_bytes=_vmem_limit(conv_bytes))
    # TODO(synk): for very large N (v7x 64 MiB VMEM) add a K axis to the grid so only
    # a (tk, D) slice of x/h1 is resident instead of the full (n_pad, D) buffer.

    # ---- pass 1: GINConv1 + ReLU, row-tiled ("parallel") ----
    h1 = pl.pallas_call(
        functools.partial(_gin_conv_kernel, apply_relu=True),
        out_shape=jax.ShapeDtypeStruct((n_pad, D), bf16),
        grid=grid,
        in_specs=[a_spec, full_spec, w_spec, b_spec, w_spec, b_spec],
        out_specs=row_spec,
        compiler_params=conv_params,
    )(a_i8, x_bf, wpad("g1_w1"), bpad("g1_b1"), wpad("g1_w2"), bpad("g1_b2"))

    # ---- pass 2: GINConv2, row-tiled ("parallel", shards over both v7x TCs) ----
    h2 = pl.pallas_call(
        functools.partial(_gin_conv_kernel, apply_relu=False),
        out_shape=jax.ShapeDtypeStruct((n_pad, D), f32),
        grid=grid,
        in_specs=[a_spec, full_spec, w_spec, b_spec, w_spec, b_spec],
        out_specs=row_spec,
        compiler_params=conv_params,
    )(a_i8, h1, wpad("g2_w1"), bpad("g2_b1"), wpad("g2_w2"), bpad("g2_b2"))

    # ---- pass 3: masked global max-pool accumulation + fc + log_softmax ----
    pool_bytes = (2 * tm * D * 4 + 2 * tm * g_pad * 4 + 2 * 2 * (D * D * 4 + D * 4)
                  + 3 * g_pad * D * 4)
    out_pad = pl.pallas_call(
        functools.partial(_pool_fc_kernel, num_graphs_padded=g_pad, num_classes=C),
        out_shape=jax.ShapeDtypeStruct((g_pad, D), f32),
        grid=grid,
        in_specs=[row_spec, mask_spec, w_spec, b_spec, w_spec, b_spec],
        out_specs=pl.BlockSpec((g_pad, D), lambda i: (0, 0)),
        scratch_shapes=[pltpu.VMEM((g_pad, D), f32)],
        compiler_params=pltpu.CompilerParams(dimension_semantics=("arbitrary",),
                                             vmem_limit_bytes=_vmem_limit(pool_bytes)),
    )(h2, mask_t, wpad("fc1_w"), bpad("fc1_b"), wpad("fc2_w"), bpad("fc2_b"))

    return out_pad[:G, :C]


# --------------------------------------------------------------------------
# Reference (pure JAX, f32) for numerical validation
# --------------------------------------------------------------------------
def _reference(x, adj, pool_mask, p):
    h = x + adj @ x
    h = jnp.maximum(h @ p["g1_w1"] + p["g1_b1"], 0.0)
    h = h @ p["g1_w2"] + p["g1_b2"]
    h = jnp.maximum(h, 0.0)
    h = h + adj @ h
    h = jnp.maximum(h @ p["g2_w1"] + p["g2_b1"], 0.0)
    h = h @ p["g2_w2"] + p["g2_b2"]
    pooled = jnp.max(jnp.where(pool_mask[:, :, None] > 0.5, h[None], -jnp.inf), axis=1)
    z = jnp.maximum(pooled @ p["fc1_w"] + p["fc1_b"], 0.0)
    z = z @ p["fc2_w"] + p["fc2_b"]
    return jax.nn.log_softmax(z, axis=1)


def _linear_params(key, fan_in, fan_out):
    """Deterministic init mimicking torch.nn.Linear default (uniform +/- 1/sqrt(fan_in))."""
    kw, kb = jax.random.split(key)
    bound = 1.0 / (fan_in ** 0.5)
    w = jax.random.uniform(kw, (fan_in, fan_out), jnp.float32, -bound, bound)
    b = jax.random.uniform(kb, (1, fan_out), jnp.float32, -bound, bound)
    return w, b


if __name__ == "__main__":
    # Small deterministic problem: 2 graphs x 24 nodes, 8 input features, hidden 32, 4 classes.
    NUM_FEATURES = 8
    HIDDEN = 32
    NUM_CLASSES = 4
    NODES_PER_GRAPH = 24
    NUM_GRAPHS = 2
    N = NODES_PER_GRAPH * NUM_GRAPHS

    key = jax.random.PRNGKey(0)
    keys = jax.random.split(key, 8)

    # Node features (keys='pos' path: x is used as-is).
    x = jax.random.normal(keys[0], (N, NUM_FEATURES), jnp.float32)

    # Directed chain edges within each graph; to_undirected == symmetrize.
    src, dst = [], []
    for g in range(NUM_GRAPHS):
        base = g * NODES_PER_GRAPH
        for i in range(NODES_PER_GRAPH - 1):
            src.append(base + i)
            dst.append(base + i + 1)
    adj = jnp.zeros((N, N), jnp.float32)
    adj = adj.at[jnp.array(src), jnp.array(dst)].set(1.0)
    adj = jnp.maximum(adj, adj.T)  # undirected adjacency

    # batch assignment -> one-hot pooling mask [G, N]
    batch = jnp.repeat(jnp.arange(NUM_GRAPHS), NODES_PER_GRAPH)
    pool_mask = (batch[None, :] == jnp.arange(NUM_GRAPHS)[:, None]).astype(jnp.float32)

    # Deterministic parameters matching the module's layer shapes.
    p = {}
    p["g1_w1"], p["g1_b1"] = _linear_params(keys[1], NUM_FEATURES, HIDDEN)
    p["g1_w2"], p["g1_b2"] = _linear_params(keys[2], HIDDEN, HIDDEN)
    p["g2_w1"], p["g2_b1"] = _linear_params(keys[3], HIDDEN, HIDDEN)
    p["g2_w2"], p["g2_b2"] = _linear_params(keys[4], HIDDEN, HIDDEN)
    p["fc1_w"], p["fc1_b"] = _linear_params(keys[5], HIDDEN, 64)
    p["fc2_w"], p["fc2_b"] = _linear_params(keys[6], 64, NUM_CLASSES)

    # tile_m=32 at N=48 (n_pad=128) gives a 4-step grid, exercising the pipelined
    # row tiling and the pooling accumulator init/finalize paths.
    out = ginnet_forward(x, adj, pool_mask, p, tile_m=32)
    out = jax.block_until_ready(out)

    # Sanity: shape, softmax rows sum to ~1, and matches f32 reference within
    # bf16 message-passing tolerance.
    assert out.shape == (NUM_GRAPHS, NUM_CLASSES)
    row_sums = jnp.sum(jnp.exp(out), axis=1)
    assert bool(jnp.all(jnp.abs(row_sums - 1.0) < 1e-4))
    ref = _reference(x, adj, pool_mask, p)
    assert bool(jnp.max(jnp.abs(out - ref)) < 0.1)

    print("KERNEL_OK")
</pallas_src>

<mosaic_0001>
module attributes {stable_mosaic.version = 11 : i64} {
  func.func @_gin_conv_kernel(%arg0: i32, %arg1: memref<32x128xi8, #tpu.memory_space<vmem>>, %arg2: memref<128x128xbf16, #tpu.memory_space<vmem>>, %arg3: memref<128x128xf32, #tpu.memory_space<vmem>>, %arg4: memref<1x128xf32, #tpu.memory_space<vmem>>, %arg5: memref<128x128xf32, #tpu.memory_space<vmem>>, %arg6: memref<1x128xf32, #tpu.memory_space<vmem>>, %arg7: memref<32x128xbf16, #tpu.memory_space<vmem>>) attributes {dimension_semantics = [#tpu.dimension_semantics<parallel>], iteration_bounds = array<i64: 4>, scalar_prefetch = 0 : i64, scratch_operands = 0 : i64, tpu.core_type = #tpu.core_type<tc>, window_params = [{transform_indices = @transform_0, window_bounds = array<i64: 32, 128>}, {pipeline_mode = #tpu.pipeline_mode<synchronous>, transform_indices = @transform_1, window_bounds = array<i64: 128, 128>}, {pipeline_mode = #tpu.pipeline_mode<synchronous>, transform_indices = @transform_2, window_bounds = array<i64: 128, 128>}, {pipeline_mode = #tpu.pipeline_mode<synchronous>, transform_indices = @transform_3, window_bounds = array<i64: 1, 128>}, {pipeline_mode = #tpu.pipeline_mode<synchronous>, transform_indices = @transform_4, window_bounds = array<i64: 128, 128>}, {pipeline_mode = #tpu.pipeline_mode<synchronous>, transform_indices = @transform_5, window_bounds = array<i64: 1, 128>}, {transform_indices = @transform_6, window_bounds = array<i64: 32, 128>}]} {
    %c0 = arith.constant 0 : index
    %c0_0 = arith.constant 0 : index
    %0 = vector.load %arg1[%c0, %c0_0] : memref<32x128xi8, #tpu.memory_space<vmem>>, vector<32x128xi8>
    %1 = arith.sitofp %0 : vector<32x128xi8> to vector<32x128xbf16>
    %c0_1 = arith.constant 0 : index
    %c0_2 = arith.constant 0 : index
    %2 = vector.load %arg2[%c0_1, %c0_2] : memref<128x128xbf16, #tpu.memory_space<vmem>>, vector<128x128xbf16>
    %cst = arith.constant dense<0.000000e+00> : vector<32x128xf32>
    %3 = tpu.matmul %1, %2, %cst {dimension_numbers = #tpu.dot_dimension_numbers<[1], [0], [0], [1], [0, 0, 1, 1], [], []>} : vector<32x128xbf16>, vector<128x128xbf16>, vector<32x128xf32> -> vector<32x128xf32>
    %c0_3 = arith.constant 0 : index
    %c0_4 = arith.constant 0 : index
    %4 = vector.load %arg3[%c0_3, %c0_4] : memref<128x128xf32, #tpu.memory_space<vmem>>, vector<128x128xf32>
    %cst_5 = arith.constant dense<0.000000e+00> : vector<32x128xf32>
    %5 = tpu.matmul %3, %4, %cst_5 {dimension_numbers = #tpu.dot_dimension_numbers<[1], [0], [0], [1], [0, 0, 1, 1], [], []>} : vector<32x128xf32>, vector<128x128xf32>, vector<32x128xf32> -> vector<32x128xf32>
    %c0_6 = arith.constant 0 : index
    %c0_7 = arith.constant 0 : index
    %6 = vector.load %arg4[%c0_6, %c0_7] : memref<1x128xf32, #tpu.memory_space<vmem>>, vector<1x128xf32>
    %7 = vector.broadcast %6 : vector<1x128xf32> to vector<32x128xf32>
    %8 = arith.addf %5, %7 : vector<32x128xf32>
    %cst_8 = arith.constant 0.000000e+00 : f32
    %9 = vector.broadcast %cst_8 : f32 to vector<32x128xf32>
    %10 = arith.maximumf %8, %9 : vector<32x128xf32>
    %c0_9 = arith.constant 0 : index
    %c0_10 = arith.constant 0 : index
    %11 = vector.load %arg5[%c0_9, %c0_10] : memref<128x128xf32, #tpu.memory_space<vmem>>, vector<128x128xf32>
    %cst_11 = arith.constant dense<0.000000e+00> : vector<32x128xf32>
    %12 = tpu.matmul %10, %11, %cst_11 {dimension_numbers = #tpu.dot_dimension_numbers<[1], [0], [0], [1], [0, 0, 1, 1], [], []>} : vector<32x128xf32>, vector<128x128xf32>, vector<32x128xf32> -> vector<32x128xf32>
    %c0_12 = arith.constant 0 : index
    %c0_13 = arith.constant 0 : index
    %13 = vector.load %arg6[%c0_12, %c0_13] : memref<1x128xf32, #tpu.memory_space<vmem>>, vector<1x128xf32>
    %14 = vector.broadcast %13 : vector<1x128xf32> to vector<32x128xf32>
    %15 = arith.addf %12, %14 : vector<32x128xf32>
    %cst_14 = arith.constant 0.000000e+00 : f32
    %16 = vector.broadcast %cst_14 : f32 to vector<32x128xf32>
    %17 = arith.maximumf %15, %16 : vector<32x128xf32>
    %18 = arith.truncf %17 : vector<32x128xf32> to vector<32x128xbf16>
    %c0_15 = arith.constant 0 : index
    %c0_16 = arith.constant 0 : index
    %19 = vector.load %arg7[%c0_15, %c0_16] : memref<32x128xbf16, #tpu.memory_space<vmem>>, vector<32x128xbf16>
    tpu.vector_store %arg7[%c0_15, %c0_16], %18 {strides = array<i32>} : memref<32x128xbf16, #tpu.memory_space<vmem>>, vector<32x128xbf16>,
    return
  }
  func.func @transform_0(%arg0: i32) -> (i32, i32) {
    %c0_i32 = arith.constant 0 : i32
    %c0_i32_0 = arith.constant 0 : i32
    return %arg0, %c0_i32 : i32, i32
  }
  func.func @transform_1(%arg0: i32) -> (i32, i32) {
    %c0_i32 = arith.constant 0 : i32
    %c0_i32_0 = arith.constant 0 : i32
    %c0_i32_1 = arith.constant 0 : i32
    return %c0_i32, %c0_i32_0 : i32, i32
  }
  func.func @transform_2(%arg0: i32) -> (i32, i32) {
    %c0_i32 = arith.constant 0 : i32
    %c0_i32_0 = arith.constant 0 : i32
    %c0_i32_1 = arith.constant 0 : i32
    return %c0_i32, %c0_i32_0 : i32, i32
  }
  func.func @transform_3(%arg0: i32) -> (i32, i32) {
    %c0_i32 = arith.constant 0 : i32
    %c0_i32_0 = arith.constant 0 : i32
    %c0_i32_1 = arith.constant 0 : i32
    return %c0_i32, %c0_i32_0 : i32, i32
  }
  func.func @transform_4(%arg0: i32) -> (i32, i32) {
    %c0_i32 = arith.constant 0 : i32
    %c0_i32_0 = arith.constant 0 : i32
    %c0_i32_1 = arith.constant 0 : i32
    return %c0_i32, %c0_i32_0 : i32, i32
  }
  func.func @transform_5(%arg0: i32) -> (i32, i32) {
    %c0_i32 = arith.constant 0 : i32
    %c0_i32_0 = arith.constant 0 : i32
    %c0_i32_1 = arith.constant 0 : i32
    return %c0_i32, %c0_i32_0 : i32, i32
  }
  func.func @transform_6(%arg0: i32) -> (i32, i32) {
    %c0_i32 = arith.constant 0 : i32
    %c0_i32_0 = arith.constant 0 : i32
    return %arg0, %c0_i32 : i32, i32
  }
}

</mosaic_0001>

<bundles_post_ra>
// kernel: tpu_custom_call.1
= control target key start
LH: loop header
LB: loop body
LE: loop exit
PB: predicated region body
PF: predicated region fallthrough
CT: control target
= control target key end

     0   :  { %s1642_s0 = inlined_call_operand.hbm [shape: s8[128,128], index: 0, kind: input, shape index: {}]   ;;  %s1643_s1 = inlined_call_operand.hbm [shape: bf16[128,128], index: 1, kind: input, shape index: {}]   ;;  %s1644_s2 = inlined_call_operand.hbm [shape: f32[128,128], index: 2, kind: input, shape index: {}]   ;;  %s1645_s3 = inlined_call_operand.vmem [shape: f32[1,128], index: 3, kind: input, shape index: {}]   ;;  %s1646_s4 = inlined_call_operand.hbm [shape: f32[128,128], index: 4, kind: input, shape index: {}]   ;;  %s1647_s5 = inlined_call_operand.vmem [shape: f32[1,128], index: 5, kind: input, shape index: {}]   ;;  %s1648_s6 = inlined_call_operand.hbm [shape: bf16[128,128], index: 6, kind: output, shape index: {}]  }
   0x1   :  { %1652 = sst [smem:[#allocation15_spill]] %s1643_s1 }
   0x2   :  { %11 = vsyncpa [#allocation3], 0 }
   0x3   :  { %13 = vsyncpa [#allocation3 + $0x1], 0 }
   0x4   :  { %14 = vsyncpa [#allocation6], 0 }
   0x5   :  { %15 = vsyncpa [#allocation9], 0 }
   0x6   :  { %16 = vsyncpa [#allocation4], 0 }
   0x7   :  { %18 = vsyncpa [#allocation4 + $0x1], 0  ;;  %s1391_s21 = smov 0   ;;  %s1393_s22 = smov 0  }
   0x8   :  { %s1395_s23 = smov 0   ;;  %s1397_s24 = smov 0  }
   0x9 LB: > { %s1412_s25 = sadd.s32 4294967295, %s1343_s24   ;;  %s789_s26 = sadd.s32 4294967294, %s1343_s24   ;;  %s1343_s24 = sphi %s1397_s24, %s1672_s24   ;;  %s1339_s23 = sphi %s1395_s23, %s1671_s23   ;;  %s1335_s22 = sphi %s1393_s22, %s1670_s22   ;;  %s1331_s21 = sphi %s1391_s21, %s1669_s21  }
   0xa   : > { %p44_p0 = scmp.ne.s32.totalorder %s1335_s22, %s1331_s21  ;;  %p1649_p1 = scmp.eq.s32.totalorder %s1412_s25, 0 }
   0xb   : > { %p179_p3 = scmp.eq.s32.totalorder %s789_s26, 3  ;;  %p790_p5 = scmp.ge.s32.totalorder %s1343_s24, 1 }
   0xc   : > { %p1421_p4 = por %p1649_p1, %p44_p0  ;;  %p186_p7 = scmp.lt.s32.totalorder %s1343_s24, 5 }
   0xd   : > { %p1426_p6 = por %p179_p3, %p44_p0  ;;  %s1345_s30 = smov [#allocation5]  }
   0xe   : > { %s1653_s27 = scalar_select %p1421_p4, 1, 0 }
   0xf   : > { %s1654_s28 = scalar_select %p1426_p6, 1, 0 }
  0x10   : > { %p1431_p8 = pnand %p790_p5, %p186_p7  ;;  %s198_s7 = sshll.u32 %s1345_s30, 4  ;;  %s199_s7 = int_to_ptr.vmem [resolvable:$true] %s198_s7 }
  0x11   : > { %s1346_s9 = smov [#allocation7]   ;;  %s1657_s1 = sld [smem:[#allocation15_spill]] }
  0x12   : > { %s1655_s29 = scalar_select %p1431_p8, 1, 0 }
  0x13   : > { %p1080_p9 = pneg %p1431_p8  ;;  %s211_s10 = sshll.u32 %s1346_s9, 4  ;;  %s1443_s10 = int_to_ptr.vmem [resolvable:$true] %s211_s10 }
  0x15   : > { %p1439_p10 = pnand %p1080_p9, %p1649_p1 }
  0x17   : > { %s1155_s13 = scalar_lea.hbm %s1657_s1, 1024  ;;  %p1453_p12 = pneg %p1439_p10 }
  0x18   : > { %p1156_p11 = scmp.ne.s32.totalorder %s1657_s1, %s1155_s13  ;;  %p1162_p3 = scmp.lt.u32.totalorder %s1155_s13, %s1657_s1 }
  0x1a   : > { %p1158_p13 = pnand %p1453_p12, %p1156_p11 }
  0x1c   : > { %p1159_p0 = pneg %p1158_p13 }
  0x1e   : > { %p1164_p5 = pnand %p1162_p3, %p1159_p0 }
  0x20   : > { %1167 = shalt.err (!%p1164_p5)
}
  0x21   : > { %s1168_s19 = scalar_lea.vmem %s199_s7, 1024  ;;  %p1176_p2 = scmp.lt.s32.totalorder %s199_s7, %s199_s7 }
  0x22   : > { %p1169_p7 = scmp.ne.s32.totalorder %s199_s7, %s1168_s19  ;;  %p1177_p6 = scmp.lt.s32.totalorder %s1168_s19, %s1168_s19 }
  0x24   : > { %p1171_p9 = pnand %p1169_p7, %p1453_p12  ;;  %p1178_p4 = por %p1177_p6, %p1176_p2 }
  0x26   : > { %p1172_p1 = pneg %p1171_p9 }
  0x28   : > { %p1179_p8 = pnand %p1178_p4, %p1172_p1 }
  0x2a   : > { %1182 = shalt.err (!%p1179_p8)
}
  0x2b   : > { %s1347_s20 = smov 64   ;;  %s1348_s26 = smov 4  }
  0x2c   : > { %1083 = dma.hbm_to_vmem [thread:$0]  (!%p1439_p10), %s1657_s1, 1024, %s199_s7, [#allocation6], %s1347_s20, %s1347_s20, %s1348_s26  }
  0x2d   : > { %s1183_s13 = scalar_lea.hbm %s1644_s2, 2048 }
  0x2e   : > { %p1184_p11 = scmp.ne.s32.totalorder %s1644_s2, %s1183_s13  ;;  %p1190_p4 = scmp.lt.u32.totalorder %s1183_s13, %s1644_s2 }
  0x30   : > { %p1186_p1 = pnand %p1184_p11, %p1453_p12 }
  0x32   : > { %p1187_p2 = pneg %p1186_p1 }
  0x34   : > { %p1192_p6 = pnand %p1190_p4, %p1187_p2 }
  0x36   : > { %1195 = shalt.err (!%p1192_p6)
}
  0x37   : > { %s1196_s7 = scalar_lea.vmem %s1443_s10, 2048  ;;  %p1204_p3 = scmp.lt.s32.totalorder %s1443_s10, %s1443_s10 }
  0x38   : > { %p1197_p8 = scmp.ne.s32.totalorder %s1443_s10, %s1196_s7  ;;  %p1205_p5 = scmp.lt.s32.totalorder %s1196_s7, %s1196_s7 }
  0x3a   : > { %p1199_p13 = pnand %p1197_p8, %p1453_p12  ;;  %p1206_p7 = por %p1205_p5, %p1204_p3 }
  0x3c   : > { %p1200_p0 = pneg %p1199_p13 }
  0x3e   : > { %p1207_p9 = pnand %p1206_p7, %p1200_p0 }
  0x40   : > { %1210 = shalt.err (!%p1207_p9)
}
  0x41   : > { %s1349_s19 = smov 128   ;;  %s1350_s20 = smov 8  }
  0x42   : > { %1086 = dma.hbm_to_vmem [thread:$0]  (!%p1439_p10), %s1644_s2, 2048, %s1443_s10, [#allocation6], %s1349_s19, %s1349_s19, %s1350_s20  }
  0x43   : > { %s1351_s9 = smov [#allocation8]   ;;  %s1493_s12 = sadd.s32 1, %s1343_s24  }
  0x44   : > { %s227_s11 = sshll.u32 %s1351_s9, 4  ;;  %s1211_s15 = scalar_lea.hbm %s1646_s4, 2048  ;;  %s228_s11 = int_to_ptr.vmem [resolvable:$true] %s227_s11 }
  0x45   : > { %p1212_p11 = scmp.ne.s32.totalorder %s1646_s4, %s1211_s15  ;;  %p1218_p4 = scmp.lt.u32.totalorder %s1211_s15, %s1646_s4 }
  0x47   : > { %p1214_p1 = pnand %p1212_p11, %p1453_p12 }
  0x49   : > { %p1215_p2 = pneg %p1214_p1 }
  0x4b   : > { %p1220_p6 = pnand %p1218_p4, %p1215_p2 }
  0x4d   : > { %1223 = shalt.err (!%p1220_p6)
}
  0x4e   : > { %s1224_s10 = scalar_lea.vmem %s228_s11, 2048  ;;  %p1232_p3 = scmp.lt.s32.totalorder %s228_s11, %s228_s11 }
  0x4f   : > { %p1225_p8 = scmp.ne.s32.totalorder %s228_s11, %s1224_s10  ;;  %p1233_p5 = scmp.lt.s32.totalorder %s1224_s10, %s1224_s10 }
  0x51   : > { %p1227_p13 = pnand %p1225_p8, %p1453_p12  ;;  %p1234_p7 = por %p1233_p5, %p1232_p3 }
  0x53   : > { %p1228_p0 = pneg %p1227_p13 }
  0x55   : > { %p1235_p9 = pnand %p1234_p7, %p1228_p0 }
  0x57   : > { %1238 = shalt.err (!%p1235_p9)
}
  0x58   : > { %1089 = dma.hbm_to_vmem [thread:$0]  (!%p1439_p10), %s1646_s4, 2048, %s228_s11, [#allocation9], %s1349_s19, %s1349_s19, %s1350_s20  }
  0x59   : > { %s28_s1 = ssub.s32 %s1343_s24, %s1493_s12  ;;  %s31_s16 = sadd.s32 1, %s1339_s23 }
  0x5a   : > { %p29_p12 = scmp.eq.s32.totalorder %s28_s1, 0  ;;  %p38_p11 = scmp.ne.s32.totalorder %s1339_s23, %s1335_s22 }
  0x5b   : > { %p39_p1 = scmp.eq.s32.totalorder %s1343_s24, 0  ;;  %p1101_p2 = scmp.lt.s32.totalorder %s1343_s24, 4 }
  0x5c   : > { %s1521_s8 = scalar_select %p29_p12, %s1339_s23, %s31_s16  }
  0x5d   : > { %p40_p4 = por %p39_p1, %p38_p11  ;;  %p1659_p6 = scmp.eq.s32.totalorder %s1412_s25, 3 }
  0x5e   : > { %s244_s13 = sand.u32 1, %s1339_s23   ;;  %s796_s14 = sshll.u32 %s1343_s24, 7 }
  0x5f   : > { %p1525_p8 = por %p1659_p6, %p38_p11  ;;  %s795_s15 = sshll.u32 %s244_s13, 3 }
  0x60   : > { %s1534_s19 = scalar_lea.hbm %s1642_s0, %s796_s14  ;;  %s248_s20 = scalar_lea.vmem [#allocation2], %s795_s15 }
  0x61   : > { %s255_s11 = sshll.u32 %s248_s20, 4  ;;  %p1536_p10 = pnand %p1101_p2, %p40_p4  ;;  %s1540_s11 = int_to_ptr.vmem [resolvable:$true] %s255_s11 }
  0x62   : > { %s245_s10 = scalar_lea.sflag [#allocation3], %s244_s13  ;;  %s1239_s26 = scalar_lea.hbm %s1534_s19, 128 }
  0x63   : > { %p1240_p13 = scmp.ne.s32.totalorder %s1534_s19, %s1239_s26  ;;  %p1241_p0 = pneg %p1536_p10 }
  0x64   : > { %s1244_s16 = scalar_lea.hbm %s1642_s0, 512  ;;  %p1245_p7 = scmp.lt.u32.totalorder %s1534_s19, %s1642_s0 }
  0x65   : > { %p1242_p3 = pnand %p1241_p0, %p1240_p13  ;;  %p1246_p9 = scmp.lt.u32.totalorder %s1244_s16, %s1239_s26 }
  0x66   : > { %p1248_p11 = scmp.lt.u32.totalorder %s1239_s26, %s1534_s19 }
  0x67   : > { %p1243_p5 = pneg %p1242_p3  ;;  %p1247_p12 = por %p1246_p9, %p1245_p7 }
  0x69   : > { %p1249_p1 = por %p1248_p11, %p1247_p12 }
  0x6b   : > { %p1250_p2 = pnand %p1249_p1, %p1243_p5 }
  0x6d   : > { %1253 = shalt.err (!%p1250_p2)
}
  0x6e   : > { %s1254_s13 = scalar_lea.vmem %s1540_s11, 128  ;;  %s1352_s17 = smov [#allocation2]  }
  0x6f   : > { %p1255_p4 = scmp.ne.s32.totalorder %s1540_s11, %s1254_s13  ;;  %s1259_s18 = sshll.u32 %s1352_s17, 4  ;;  %s1260_s18 = int_to_ptr.vmem [resolvable:$false] %s1259_s18 }
  0x70   : > { %s1261_s20 = scalar_lea.vmem %s1260_s18, 256  ;;  %p1262_p3 = scmp.lt.s32.totalorder %s1540_s11, %s1260_s18 }
  0x71   : > { %p1257_p6 = pnand %p1255_p4, %p1241_p0  ;;  %p1263_p7 = scmp.lt.s32.totalorder %s1261_s20, %s1254_s13 }
  0x73   : > { %p1258_p13 = pneg %p1257_p6  ;;  %p1264_p9 = por %p1263_p7, %p1262_p3 }
  0x75   : > { %p1265_p12 = pnand %p1264_p9, %p1258_p13 }
  0x77   : > { %1268 = shalt.err (!%p1265_p12)
}
  0x78   : > { %1093 = dma.hbm_to_vmem [thread:$0]  (!%p1536_p10), %s1534_s19, 128, %s1540_s11, %s245_s10  }
  0x79   : > { %p1662_p5 = scmp.ne.s32.totalorder %s1655_s29, 0 }
  0x7a   : > { %s1570_s26 = sand.u32 (!%p1662_p5), 1, %s1335_s22   ;;  %p1663_p0 = scmp.ne.s32.totalorder (!%p1662_p5), %s1653_s27, 0 }
  0x7b   : > { %264 = sbr.rel (%p1662_p5) target bundleno = 842 (0x34a), region = 44  ;;  %s798_s30 = sshll.u32 (!%p1662_p5), %s1570_s26, 3 }
  0x7c   : > { %s267_s1 = scalar_lea.sflag (!%p1662_p5), [#allocation3], %s1570_s26  ;;  %s270_s16 = scalar_lea.vmem (!%p1662_p5), [#allocation2], %s798_s30 }
  0x82   : > { %1314 = dma.done.wait (%p1663_p0), %s267_s1, 128  }
  0x83   : > { %1316 = vsyncadd (%p1663_p0), %s267_s1, 4294967168  ;;  %p1664_p11 = scmp.eq.s32.totalorder %s1412_s25, 0 }
  0x85   : > { %1318 = dma.done.wait (%p1664_p11), [#allocation6], 3072   ;;  %p1665_p10 = pmov %p1664_p11 }
  0x87   : > { %1320 = vsyncadd (%p1665_p10), [#allocation6], 4294964224  ;;  %p1666_p1 = pmov %p1665_p10 }
  0x89   : > { %1322 = dma.done.wait (%p1666_p1), [#allocation9], 2048   ;;  %p1667_p2 = pmov %p1666_p1 }
  0x8a   : > { %v1147_v0 = vld [vmem:[#allocation5] sm:$0xff]   ;;  %v1148_v1 = vld [vmem:[#allocation5 + $0x8] sm:$0xff]   ;;  %v1149_v2 = vld [vmem:[#allocation5 + $0x10] sm:$0xff]   ;;  %s802_s7 = sshll.u32 %s1570_s26, 4  ;;  %s826_s15 = sshll.u32 %s1412_s25, 8 }
  0x8b   : > { %1324 = vsyncadd (%p1667_p2), [#allocation9], 4294965248  ;;  %888 = vmatprep.subr.bf16.mxu0 %v1147_v0  ;;  %v1150_v3 = vld [vmem:[#allocation5 + $0x18] sm:$0xff]   ;;  %v429_v5 = vld [vmem:[#allocation7] sm:$0xff]  ;;  %s310_s10 = scalar_lea.vmem [#allocation10], %s802_s7  ;;  %s1599_s18 = scalar_lea.hbm %s1648_s6, %s826_s15 }
  0x8c   : > { %889 = vmatpush3.bf16.msra.mxu0 %v1147_v0  ;;  %v313_v4 = vld [vmem:[%s270_s16] sm:$0xff]  ;;  %v430_v6 = vld [vmem:[#allocation7 + $0x8] sm:$0xff]  ;;  %v433_v12 = vld [vmem:[#allocation7 + $0x20] sm:$0xff]  ;;  %s687_s14 = sshll.u32 %s310_s10, 4  ;;  %s674_s20 = scalar_lea.sflag [#allocation4], %s1570_s26  ;;  %s1594_s14 = int_to_ptr.vmem [resolvable:$true] %s687_s14 }
  0x8d   : > { %890 = vmatprep.subr.bf16.mxu0 %v1148_v1  ;;  %v314_v7 = vunpack.c.l.s8.bf16 %v313_v4  ;;  %v984_v8 = vpack.c.bf16 %v430_v6, %v429_v5  ;;  %v431_v9 = vld [vmem:[#allocation7 + $0x10] sm:$0xff]  ;;  %v432_v10 = vld [vmem:[#allocation7 + $0x18] sm:$0xff]  ;;  %v434_v13 = vld [vmem:[#allocation7 + $0x28] sm:$0xff]  ;;  %v315_v30 = vunpack.c.h.s8.bf16 %v313_v4  ;;  %s1269_s30 = scalar_lea.vmem %s1594_s14, 256  ;;  %s1353_s25 = smov [#allocation10]  }
  0x8e   : > { %v988_v11 = vpack.c.bf16 %v432_v10, %v431_v9  ;;  %v1151_v14 = vld [vmem:[#allocation5 + $0x20] sm:$0xff]   ;;  %v992_v15 = vpack.c.bf16 %v434_v13, %v433_v12  ;;  %v435_v16 = vld [vmem:[#allocation7 + $0x30] sm:$0xff]  ;;  %v436_v17 = vld [vmem:[#allocation7 + $0x38] sm:$0xff]  ;;  %p1270_p4 = scmp.ne.s32.totalorder %s1594_s14, %s1269_s30  ;;  %s1273_s1 = sshll.u32 %s1353_s25, 4  ;;  %s1274_s1 = int_to_ptr.vmem [resolvable:$false] %s1273_s1 }
  0x8f   : > { %904 = vmatprep.mubr.bf16.mxu0 %v314_v7  ;;  %985 = vmatprep.subr.bf16.mxu1 %v984_v8  ;;  %v1152_v18 = vld [vmem:[#allocation5 + $0x28] sm:$0xff]   ;;  %v996_v19 = vpack.c.bf16 %v436_v17, %v435_v16  ;;  %v437_v20 = vld [vmem:[#allocation7 + $0x40] sm:$0xff]  ;;  %v1153_v22 = vld [vmem:[#allocation5 + $0x30] sm:$0xff]   ;;  %s1275_s16 = scalar_lea.vmem %s1274_s1, 512  ;;  %p1276_p3 = scmp.lt.s32.totalorder %s1594_s14, %s1274_s1 }
  0x90   : > { %891 = vmatpush3.bf16.msra.mxu0 %v1148_v1  ;;  %987 = vmatpush3.bf16.msra.mxu1 %v984_v8  ;;  %v438_v21 = vld [vmem:[#allocation7 + $0x48] sm:$0xff]  ;;  %v439_v24 = vld [vmem:[#allocation7 + $0x50] sm:$0xff]  ;;  %v440_v25 = vld [vmem:[#allocation7 + $0x58] sm:$0xff]  ;;  %p1271_p6 = pnand %p1270_p4, %p1525_p8  ;;  %p1277_p7 = scmp.lt.s32.totalorder %s1275_s16, %s1269_s30 }
  0x91   : > { %892 = vmatprep.subr.bf16.mxu0 %v1149_v2  ;;  %989 = vmatprep.subr.bf16.mxu1 %v988_v11  ;;  %v1000_v23 = vpack.c.bf16 %v438_v21, %v437_v20  ;;  %v1154_v26 = vld [vmem:[#allocation5 + $0x38] sm:$0xff]   ;;  %v1004_v27 = vpack.c.bf16 %v440_v25, %v439_v24  ;;  %v441_v28 = vld [vmem:[#allocation7 + $0x60] sm:$0xff]  ;;  %v442_v29 = vld [vmem:[#allocation7 + $0x68] sm:$0xff] }
  0x92   : > { %v1008_v31 = vpack.c.bf16 %v442_v29, %v441_v28  ;;  %v443_v32 = vld [vmem:[#allocation7 + $0x70] sm:$0xff]  ;;  %v444_v33 = vld [vmem:[#allocation7 + $0x78] sm:$0xff]  ;;  %v541_v35 = vld [vmem:[#allocation8] sm:$0xff]  ;;  %p1272_p13 = pneg %p1271_p6  ;;  %p1278_p9 = por %p1277_p7, %p1276_p3 }
  0x93   : > { %v1012_v34 = vpack.c.bf16 %v444_v33, %v443_v32  ;;  %v542_v36 = vld [vmem:[#allocation8 + $0x8] sm:$0xff]  ;;  %v543_v37 = vld [vmem:[#allocation8 + $0x10] sm:$0xff]  ;;  %v544_v39 = vld [vmem:[#allocation8 + $0x18] sm:$0xff] }
  0x94   : > { %893 = vmatpush3.bf16.msra.mxu0 %v1149_v2  ;;  %991 = vmatpush3.bf16.msra.mxu1 %v988_v11  ;;  %v1016_v38 = vpack.c.bf16 %v542_v36, %v541_v35  ;;  %v1020_v40 = vpack.c.bf16 %v544_v39, %v543_v37  ;;  %v545_v41 = vld [vmem:[#allocation8 + $0x20] sm:$0xff]  ;;  %v546_v42 = vld [vmem:[#allocation8 + $0x28] sm:$0xff]  ;;  %v547_v44 = vld [vmem:[#allocation8 + $0x30] sm:$0xff]  ;;  %p1279_p12 = pnand %p1278_p9, %p1272_p13 }
  0x95   : > { %894 = vmatprep.subr.bf16.mxu0 %v1150_v3  ;;  %993 = vmatprep.subr.bf16.mxu1 %v992_v15  ;;  %v1024_v43 = vpack.c.bf16 %v546_v42, %v545_v41  ;;  %v548_v45 = vld [vmem:[#allocation8 + $0x38] sm:$0xff]  ;;  %v549_v47 = vld [vmem:[#allocation8 + $0x40] sm:$0xff]  ;;  %v550_v48 = vld [vmem:[#allocation8 + $0x48] sm:$0xff] }
  0x96   : > { %v1028_v46 = vpack.c.bf16 %v548_v45, %v547_v44  ;;  %v1032_v49 = vpack.c.bf16 %v550_v48, %v549_v47  ;;  %v551_v50 = vld [vmem:[#allocation8 + $0x50] sm:$0xff]  ;;  %v552_v51 = vld [vmem:[#allocation8 + $0x58] sm:$0xff]  ;;  %v553_v53 = vld [vmem:[#allocation8 + $0x60] sm:$0xff] }
  0x97   : > { %v1036_v52 = vpack.c.bf16 %v552_v51, %v551_v50  ;;  %v554_v54 = vld [vmem:[#allocation8 + $0x68] sm:$0xff]  ;;  %v555_v60 = vld [vmem:[#allocation8 + $0x70] sm:$0xff]  ;;  %v556_v61 = vld [vmem:[#allocation8 + $0x78] sm:$0xff] }
  0x98   : > { %895 = vmatpush3.bf16.msra.mxu0 %v1150_v3  ;;  %995 = vmatpush3.bf16.msra.mxu1 %v992_v15  ;;  %v1040_v55 = vpack.c.bf16 %v554_v54, %v553_v53  ;;  %v1044_v62 = vpack.c.bf16 %v556_v61, %v555_v60  ;;  %v811_v63 = vld [vmem:[%s1645_s3] ss:$0 sm:$0xff] }
  0x99   : > { %896 = vmatprep.subr.bf16.mxu0 %v1151_v14  ;;  %997 = vmatprep.subr.bf16.mxu1 %v996_v19  ;;  %v812_v12 = vld [vmem:[%s1647_s5] ss:$0 sm:$0xff] }
  0x9c   : > { %897 = vmatpush3.bf16.msra.mxu0 %v1151_v14  ;;  %999 = vmatpush3.bf16.msra.mxu1 %v996_v19 }
  0x9d   : > { %898 = vmatprep.subr.bf16.mxu0 %v1152_v18  ;;  %1001 = vmatprep.subr.bf16.mxu1 %v1000_v23 }
  0xa0   : > { %899 = vmatpush3.bf16.msra.mxu0 %v1152_v18  ;;  %1003 = vmatpush3.bf16.msra.mxu1 %v1000_v23 }
  0xa1   : > { %900 = vmatprep.subr.bf16.mxu0 %v1153_v22  ;;  %1005 = vmatprep.subr.bf16.mxu1 %v1004_v27 }
  0xa4   : > { %901 = vmatpush3.bf16.msra.mxu0 %v1153_v22  ;;  %1007 = vmatpush3.bf16.msra.mxu1 %v1004_v27 }
  0xa5   : > { %902 = vmatprep.subr.bf16.mxu0 %v1154_v26  ;;  %1009 = vmatprep.subr.bf16.mxu1 %v1008_v31 }
  0xa8   : > { %903 = vmatpush3.bf16.msra.mxu0 %v1154_v26  ;;  %1011 = vmatpush3.bf16.msra.mxu1 %v1008_v31 }
  0xa9   : > { %1013 = vmatprep.subr.bf16.mxu1 %v1012_v34  ;;  %1017 = vmatprep.subr.bf16.mxu0 %v1016_v38 }
  0xab   : > { %905 = vmatmul.mubr.bf16.vlgmr.msra.gmra.mrb[0].mxu0 %v315_v30 }
  0xac   : > { %1015 = vmatpush3.bf16.msra.mxu1 %v1012_v34  ;;  %1019 = vmatpush3.bf16.msra.mxu0 %v1016_v38 }
  0xad   : > { %1048 = vmatprep.subr.bf16.mxu1 %v1016_v38  ;;  %1021 = vmatprep.subr.bf16.mxu0 %v1020_v40 }
  0xb0   : > { %1023 = vmatpush3.bf16.msra.mxu0 %v1020_v40 }
  0xb1   : > { %1025 = vmatprep.subr.bf16.mxu0 %v1024_v43 }
  0xb4   : > { %1027 = vmatpush3.bf16.msra.mxu0 %v1024_v43 }
  0xb5   : > { %1029 = vmatprep.subr.bf16.mxu0 %v1028_v46 }
  0xb8   : > { %1031 = vmatpush3.bf16.msra.mxu0 %v1028_v46 }
  0xb9   : > { %1033 = vmatprep.subr.bf16.mxu0 %v1032_v49 }
  0xbc   : > { %1035 = vmatpush3.bf16.msra.mxu0 %v1032_v49 }
  0xbd   : > { %1037 = vmatprep.subr.bf16.mxu0 %v1036_v52 }
  0xc0   : > { %1039 = vmatpush3.bf16.msra.mxu0 %v1036_v52 }
  0xc1   : > { %1041 = vmatprep.subr.bf16.mxu0 %v1040_v55 }
  0xc4   : > { %1043 = vmatpush3.bf16.msra.mxu0 %v1040_v55 }
  0xc5   : > { %1045 = vmatprep.subr.bf16.mxu0 %v1044_v62 }
  0xc8   : > { %1047 = vmatpush3.bf16.msra.mxu0 %v1044_v62 }
 0x17e   : > { %v906_v56 = vpop.f32.mrb[0].mxu0 }
 0x17f   : > { %v414_v57 = vpop.f32.mrb[1].mxu0 }
 0x180   : > { %v907_v58 = vpop.f32.mrb[2].mxu0  ;;  %940 = vmatprep.mubr.f32.mxu1 %v414_v57 }
 0x181   : > { %v417_v59 = vpop.f32.mrb[3].mxu0 }
 0x182   : > { %941 = vmatmul.mubr.f32.vlgmr.msra.gmra.mrb[0].mxu1 %v417_v59 }
 0x183   : > { %943 = vmatprep.mubr.f32.mxu1 %v906_v56  ;;  %1056 = vmatpush3.bf16.msra.mxu1 %v1016_v38 }
 0x184   : > { %1049 = vmatprep.subr.bf16.mxu1 %v1020_v40 }
 0x186   : > { %944 = vmatmul.mubr.f32.gmra.mrb[2].mxu1 %v907_v58 }
 0x187   : > { %1057 = vmatpush3.bf16.msra.mxu1 %v1020_v40 }
 0x188   : > { %1050 = vmatprep.subr.bf16.mxu1 %v1024_v43 }
 0x18b   : > { %1058 = vmatpush3.bf16.msra.mxu1 %v1024_v43 }
 0x18c   : > { %1051 = vmatprep.subr.bf16.mxu1 %v1028_v46 }
 0x18f   : > { %1059 = vmatpush3.bf16.msra.mxu1 %v1028_v46 }
 0x190   : > { %1052 = vmatprep.subr.bf16.mxu1 %v1032_v49 }
 0x193   : > { %1060 = vmatpush3.bf16.msra.mxu1 %v1032_v49 }
 0x194   : > { %1053 = vmatprep.subr.bf16.mxu1 %v1036_v52 }
 0x197   : > { %1061 = vmatpush3.bf16.msra.mxu1 %v1036_v52 }
 0x198   : > { %1054 = vmatprep.subr.bf16.mxu1 %v1040_v55 }
 0x19b   : > { %1062 = vmatpush3.bf16.msra.mxu1 %v1040_v55 }
 0x19c   : > { %1055 = vmatprep.subr.bf16.mxu1 %v1044_v62 }
 0x19f   : > { %1063 = vmatpush3.bf16.msra.mxu1 %v1044_v62 }
 0x255   : > { %v942_v0 = vpop.f32.mrb[0].mxu1 }
 0x256   : > { %v524_v1 = vadd.f32 %v942_v0, %v811_v63  ;;  %v518_v2 = vpop.f32.mrb[1].mxu1 }
 0x257   : > { %v519_v3 = vadd.f32 %v811_v63, %v518_v2 }
 0x258   : > { %v538_v6 = vmax.f32 %v524_v1, 0.0 }
 0x259   : > { %v537_v4 = vmax.f32 %v519_v3, 0.0  ;;  %v945_v5 = vpop.f32.mrb[2].mxu1 }
 0x25a   : > { %v534_v7 = vadd.f32 %v945_v5, %v811_v63  ;;  %v528_v8 = vpop.f32.mrb[3].mxu1 }
 0x25b   : > { %v529_v9 = vadd.f32 %v811_v63, %v528_v8  ;;  %978 = vmatprep.mubr.f32.mxu0 %v537_v4 }
 0x25c   : > { %979 = vmatmul.mubr.f32.vlgmr.msra.gmra.mrb[4].mxu0 %v538_v6  ;;  %v540_v11 = vmax.f32 %v534_v7, 0.0 }
 0x25d   : > { %v539_v10 = vmax.f32 %v529_v9, 0.0 }
 0x25f   : > { %981 = vmatprep.mubr.f32.mxu1 %v539_v10 }
 0x260   : > { %982 = vmatmul.mubr.f32.vlgmr.msra.gmra.mrb[4].mxu1 %v540_v11 }
 0x32f   : > { %v980_v13 = vpop.f32.mrb[4].mxu0 }
 0x330   : > { %v636_v14 = vadd.f32 %v980_v13, %v812_v12  ;;  %v630_v15 = vpop.f32.mrb[5].mxu0 }
 0x331   : > { %v631_v16 = vadd.f32 %v812_v12, %v630_v15 }
 0x332   : > { %v650_v17 = vmax.f32 %v636_v14, 0.0 }
 0x333   : > { %v649_v18 = vmax.f32 %v631_v16, 0.0  ;;  %v983_v19 = vpop.f32.mrb[4].mxu1 }
 0x334   : > { %v646_v20 = vadd.f32 %v983_v19, %v812_v12  ;;  %v640_v21 = vpop.f32.mrb[5].mxu1 }
 0x335   : > { %v830_v22 = vpack.c.bf16 %v650_v17, %v649_v18  ;;  %v641_v23 = vadd.f32 %v812_v12, %v640_v21 }
 0x336   : > { %v652_v24 = vmax.f32 %v646_v20, 0.0 }
 0x337   : > { %831 = vst [vmem:[%s310_s10] sm:$0xff] %v830_v22   ;;  %v651_v25 = vmax.f32 %v641_v23, 0.0 }
 0x339   : > { %v835_v26 = vpack.c.bf16 %v652_v24, %v651_v25 }
 0x33b   : > { %837 = vst [vmem:[%s310_s10 + $0x8] sm:$0xff] %v835_v26  }
 0x33c   : > { %1282 = shalt.err (!%p1279_p12)
}
 0x33d   : > { %s1283_s27 = scalar_lea.hbm %s1599_s18, 256  ;;  %s1287_s11 = scalar_lea.hbm %s1648_s6, 1024 }
 0x33e   : > { %p1284_p5 = scmp.ne.s32.totalorder %s1599_s18, %s1283_s27  ;;  %p1288_p10 = scmp.lt.u32.totalorder %s1599_s18, %s1648_s6 }
 0x33f   : > { %p1289_p1 = scmp.lt.u32.totalorder %s1287_s11, %s1283_s27  ;;  %p1291_p4 = scmp.lt.u32.totalorder %s1283_s27, %s1599_s18 }
 0x340   : > { %p1285_p0 = pnand %p1284_p5, %p1525_p8 }
 0x341   : > { %p1290_p2 = por %p1289_p1, %p1288_p10 }
 0x342   : > { %p1286_p11 = pneg %p1285_p0 }
 0x343   : > { %p1292_p6 = por %p1291_p4, %p1290_p2 }
 0x345   : > { %p1293_p13 = pnand %p1292_p6, %p1286_p11 }
 0x347   : > { %1296 = shalt.err (!%p1293_p13)
}
 0x348   : > { %s1354_s15 = smov 64   ;;  %s1355_s13 = smov 4  }
 0x349   : > { %1078 = dma.vmem_to_hbm [thread:$0]  (%p1525_p8), %s1594_s14, 256, %s1599_s18, %s674_s20, %s1354_s15, %s1354_s15, %s1355_s13  }
 0x34a PF: > { %p1105_p3 = scmp.ge.s32.totalorder %s1343_s24, 2  ;;  %s702_s17 = sand.u32 1, %s1331_s21  }
 0x34b   : > { %p1668_p7 = scmp.ne.s32.totalorder %s1654_s28, 0  ;;  %s703_s30 = scalar_lea.sflag [#allocation4], %s702_s17 }
 0x34d   : > { %p1095_p9 = pnand %p1105_p3, %p1668_p7 }
 0x34f   : > { %1326 = dma.done.wait (!%p1095_p9), %s703_s30, 256  }
 0x350   : > { %1328 = vsyncadd (!%p1095_p9), %s703_s30, 4294967040  ;;  %p21_p12 = scmp.ge.s32.totalorder %s1493_s12, 6   ;;  %s1669_s21 = smov %s1335_s22 }
 0x351   : > { %s1670_s22 = smov %s1339_s23  ;;  %s1671_s23 = smov %s1521_s8 }
 0x352   : > { %s1672_s24 = smov %s1493_s12  ;;  %23 = sbr.rel (!%p21_p12) target bundleno = 9 (0x9), region = 101 }
 0x359   :  { %708 = vsyncpa [#allocation3], 1 }
 0x35a   :  { %710 = vsyncpa [#allocation3 + $0x1], 1 }
 0x35b   :  { %711 = vsyncpa [#allocation6], 1 }
 0x35c   :  { %712 = vsyncpa [#allocation9], 1 }
 0x35d   :  { %713 = vsyncpa [#allocation4], 1 }
 0x35e   :  { %715 = vsyncpa [#allocation4 + $0x1], 1 }

</bundles_post_ra>
